<compile_context>
chip_gen: v7x
topology: tpu7x:2x2x1
jax: 0.10.0
libtpu: 0.0.40
codegen_flags: <defaults>
</compile_context>

<pallas_src>
import functools
import math

import jax
import jax.numpy as jnp
from jax.experimental import pallas as pl
from jax.experimental.pallas import tpu as pltpu

_LANE = 128
_SUBLANE = 8
_SQRT_2_OVER_PI = 0.7978845608028654


def _round_up(x, m):
    return ((x + m - 1) // m) * m


# --------------------------------------------------------------------------- #
# Kernel
# --------------------------------------------------------------------------- #
def _geglu_kernel(x_ref, w_ref, b_ref, o_ref, *, tile_n, epilogue_dtype,
                  approx_gelu):
    # x_ref: (tile_m, dim_in)        activations (native dtype)
    # w_ref: (dim_in, 2*tile_n)      fused weights: [val cols | gate cols] of tile
    # b_ref: (1, 2*tile_n) f32       fused bias for this N tile
    # o_ref: (tile_m, tile_n)
    x = x_ref[...]
    w = w_ref[...]
    # Run the MXU in the narrower operand dtype (bf16-native on all generations)
    # with f32 accumulation; avoids a silently promoted f32 matmul.
    if x.dtype != w.dtype:
        narrow = x.dtype if x.dtype.itemsize <= w.dtype.itemsize else w.dtype
        x = x.astype(narrow)
        w = w.astype(narrow)
    y = jnp.dot(x, w, preferred_element_type=jnp.float32)
    y = (y + b_ref[...]).astype(epilogue_dtype)     # bias add in f32, one downcast
    val = y[:, :tile_n]
    gate = y[:, tile_n:]
    if approx_gelu:
        # tanh-form GELU: transcendental on the EUP slot, few (bf16-friendly)
        # VALU ops. Used only for bf16 outputs on bf16-VPU chips (v6e/v7x).
        u = _SQRT_2_OVER_PI * (gate + 0.044715 * (gate * gate * gate))
        t = jnp.tanh(u.astype(jnp.float32)).astype(epilogue_dtype)
        gelu_gate = 0.5 * gate * (1.0 + t)
    else:
        # exact erf-based GELU (matches torch.nn.functional.gelu default)
        gelu_gate = 0.5 * gate * (1.0 + jax.lax.erf(gate * (1.0 / math.sqrt(2.0))))
    o_ref[...] = (val * gelu_gate).astype(o_ref.dtype)


# --------------------------------------------------------------------------- #
# Hardware / tiling plan
# --------------------------------------------------------------------------- #
def _tpu_physical_vmem_bytes():
    try:
        return int(pltpu.get_tpu_info().vmem_capacity_bytes)
    except Exception:
        return 64 * 1024 * 1024        # conservative default (v7x per-core VMEM)


def _chip_has_bf16_vpu():
    """True on chips with a bf16-native VPU/EUP (v6e, v7x)."""
    try:
        kind = jax.devices()[0].device_kind.lower()
    except Exception:
        return False
    if any(t in kind for t in ("v2", "v3", "v4", "v5")):
        return False
    return any(t in kind for t in ("v6", "v7", "7x"))


def _n_tile_candidates(dim_out):
    if dim_out % _LANE == 0:
        # all 128-multiple divisors, largest first (largest -> fewest x re-reads)
        return [d for d in range(dim_out, 0, -_LANE) if dim_out % d == 0]
    # tiny / odd dim_out: single full-width tile (Mosaic pads the lanes)
    return [dim_out]


def _m_tile_candidates(M, cap=512):
    m_cap = min(cap, _round_up(M, _SUBLANE))
    cands = [m for m in (512, 256, 128, 64, 32, 16, 8) if m <= m_cap]
    if not cands or cands[0] != m_cap:
        cands = [m_cap] + cands
    return cands


def _vmem_tile_bytes(tm, tn, dim_in, x_bytes, w_bytes, o_bytes, w_bufs):
    """Rough VMEM footprint of one pipeline configuration."""
    x_blk = 2 * tm * dim_in * x_bytes              # double-buffered activations
    w_blk = w_bufs * dim_in * (2 * tn) * w_bytes   # fused weight tile
    b_blk = w_bufs * (2 * tn) * 4                  # fused bias tile (f32)
    o_blk = 2 * tm * tn * o_bytes                  # double-buffered output
    y_tmp = tm * (2 * tn) * 4                      # f32 matmul result slab
    return x_blk + w_blk + b_blk + o_blk + y_tmp


def _plan(M, dim_in, dim_out, x_dtype, w_dtype, o_dtype, *,
          tile_n=None, tile_m=None):
    """Pick (tile_m, tile_n, single_weight_buffer, vmem_limit) for this chip."""
    vmem_limit = int(_tpu_physical_vmem_bytes() * 0.85)   # compiler-scratch headroom
    budget = int(vmem_limit * 0.8)                        # extra pipeline headroom
    xb = jnp.dtype(x_dtype).itemsize
    wb = jnp.dtype(w_dtype).itemsize
    ob = jnp.dtype(o_dtype).itemsize
    n_cands = [tile_n] if tile_n is not None else _n_tile_candidates(dim_out)
    if tile_m is not None:
        m_cands = [min(_round_up(tile_m, _SUBLANE), _round_up(M, _SUBLANE))]
    else:
        m_cands = _m_tile_candidates(M)
    for tn in n_cands:               # prefer the largest N tile (fewest x re-reads)
        for tm in m_cands:           # then the largest M tile (fewest grid steps)
            for w_bufs in (2, 1):    # prefer double-buffered weights, else Buffered(1)
                if _vmem_tile_bytes(tm, tn, dim_in, xb, wb, ob, w_bufs) <= budget:
                    return tm, tn, (w_bufs == 1), vmem_limit
    # Nothing fits the budget: smallest tiles, single weight buffer (see K-tiling TODO).
    return m_cands[-1], n_cands[-1], True, vmem_limit


# --------------------------------------------------------------------------- #
# Parameter prep (one-time; cache the result outside the hot path)
# --------------------------------------------------------------------------- #
def prepare_geglu_params(weight, bias, *, tile_n, param_dtype=None):
    """weight: (2*dim_out, dim_in) PyTorch nn.Linear layout; bias: (2*dim_out,).

    Returns (w_fused, b_fused) where each N tile's columns are
    [val cols of tile | gate cols of tile]."""
    two_dout, dim_in = weight.shape
    dim_out = two_dout // 2
    assert dim_out % tile_n == 0, (dim_out, tile_n)
    n_tiles = dim_out // tile_n

    wx = weight[:dim_out, :].T                       # (dim_in, dim_out)  value half
    wg = weight[dim_out:, :].T                       # (dim_in, dim_out)  gate half
    w_fused = jnp.stack(
        [wx.reshape(dim_in, n_tiles, tile_n),
         wg.reshape(dim_in, n_tiles, tile_n)], axis=2
    ).reshape(dim_in, 2 * dim_out)
    if param_dtype is not None:
        w_fused = w_fused.astype(param_dtype)

    bx = bias[:dim_out]
    bg = bias[dim_out:]
    b_fused = jnp.stack(
        [bx.reshape(n_tiles, tile_n), bg.reshape(n_tiles, tile_n)], axis=1
    ).reshape(1, 2 * dim_out).astype(jnp.float32)
    return w_fused, b_fused


def _fused_param_specs(dim_in, tile_n, single_buffer):
    w_shape = (dim_in, 2 * tile_n)
    b_shape = (1, 2 * tile_n)
    w_map = lambda j, i: (0, j)
    b_map = lambda j, i: (0, j)
    if single_buffer:
        # These blocks only change on the outer N axis: a single pipeline buffer
        # halves their VMEM cost; the one DMA stall per N tile is amortized over
        # all inner M steps.
        try:
            return (pl.BlockSpec(w_shape, w_map, pipeline_mode=pl.Buffered(1)),
                    pl.BlockSpec(b_shape, b_map, pipeline_mode=pl.Buffered(1)))
        except (TypeError, ValueError, AttributeError):
            pass   # older JAX without pipeline_mode / Buffered
    return pl.BlockSpec(w_shape, w_map), pl.BlockSpec(b_shape, b_map)


# --------------------------------------------------------------------------- #
# Apply
# --------------------------------------------------------------------------- #
def geglu_apply(x, w_fused, b_fused, *, dim_out, tile_n, tile_m=None,
                fast_epilogue=None):
    """x: (..., dim_in) -> (..., dim_out) using pre-fused params."""
    dim_in = x.shape[-1]
    lead = x.shape[:-1]
    M = math.prod(lead) if lead else 1
    x2d = x.reshape(M, dim_in)
    out_dtype = x.dtype
    assert w_fused.shape == (dim_in, 2 * dim_out)
    assert dim_out % tile_n == 0

    tm, tn, single_w_buf, vmem_limit = _plan(
        M, dim_in, dim_out, x.dtype, w_fused.dtype, out_dtype,
        tile_n=tile_n, tile_m=tile_m)
    n_n_tiles = dim_out // tn
    n_m_tiles = pl.cdiv(M, tm)

    if fast_epilogue is None:
        fast_epilogue = (jnp.dtype(out_dtype) == jnp.bfloat16) and _chip_has_bf16_vpu()
    epilogue_dtype = jnp.bfloat16 if fast_epilogue else jnp.float32

    xb = jnp.dtype(x.dtype).itemsize
    ob = jnp.dtype(out_dtype).itemsize
    cost = pl.CostEstimate(
        flops=2 * M * dim_in * 2 * dim_out,
        transcendentals=M * dim_out,
        bytes_accessed=(M * dim_in * xb * n_n_tiles        # x re-read per N tile
                        + w_fused.size * jnp.dtype(w_fused.dtype).itemsize
                        + b_fused.size * 4
                        + M * dim_out * ob),
    )

    kernel = functools.partial(_geglu_kernel, tile_n=tn,
                               epilogue_dtype=epilogue_dtype,
                               approx_gelu=fast_epilogue)
    w_spec, b_spec = _fused_param_specs(dim_in, tn, single_w_buf)

    out2d = pl.pallas_call(
        kernel,
        out_shape=jax.ShapeDtypeStruct((M, dim_out), out_dtype),
        grid_spec=pltpu.PrefetchScalarGridSpec(
            num_scalar_prefetch=0,
            # N axis OUTER: weight tile stays resident across all M steps.
            # Ragged M is handled by the grid (masked edge block), no pad/slice.
            grid=(n_n_tiles, n_m_tiles),
            in_specs=[
                pl.BlockSpec((tm, dim_in), lambda j, i: (i, 0)),   # x rows
                w_spec,                                            # fused W tile
                b_spec,                                            # fused bias tile
            ],
            out_specs=pl.BlockSpec((tm, tn), lambda j, i: (i, j)),
        ),
        compiler_params=pltpu.CompilerParams(
            dimension_semantics=("parallel", "parallel"),
            vmem_limit_bytes=vmem_limit,
        ),
        cost_estimate=cost,
    )(x2d, w_fused, b_fused)

    return out2d.reshape(lead + (dim_out,))


def geglu(x, weight, bias, *, tile_m=None, tile_n=None, param_dtype=None,
          fast_epilogue=None):
    """Convenience wrapper: re-layout params then run the kernel.

    NOTE: the weight re-layout is an O(dim_in * 2*dim_out) HBM shuffle; in a model,
    call prepare_geglu_params once per layer, cache (w_fused, b_fused, tile_n), and
    call geglu_apply directly per forward pass.

    x:      (..., dim_in)
    weight: (2*dim_out, dim_in)   PyTorch nn.Linear layout
    bias:   (2*dim_out,)
    param_dtype: defaults to x.dtype so the MXU sees matched operand dtypes
                 (pass jnp.bfloat16 with f32 x to force the bf16 MXU path).
    """
    dim_out = weight.shape[0] // 2
    dim_in = weight.shape[1]
    if param_dtype is None:
        param_dtype = x.dtype
    lead = x.shape[:-1]
    M = math.prod(lead) if lead else 1
    tm, tn, _single, _lim = _plan(M, dim_in, dim_out, x.dtype, param_dtype,
                                  x.dtype, tile_n=tile_n, tile_m=tile_m)
    w_fused, b_fused = prepare_geglu_params(weight, bias, tile_n=tn,
                                            param_dtype=param_dtype)
    return geglu_apply(x, w_fused, b_fused, dim_out=dim_out, tile_n=tn,
                       tile_m=tm, fast_epilogue=fast_epilogue)


# --------------------------------------------------------------------------- #
# Self-test
# --------------------------------------------------------------------------- #
if __name__ == "__main__":
    # Small shapes consistent with the module: batch=2, seq=8, dim_in=32, dim_out=32
    batch, seq, dim_in, dim_out = 2, 8, 32, 32

    key = jax.random.PRNGKey(0)
    kx, kw, kb = jax.random.split(key, 3)

    x = jax.random.normal(kx, (batch, seq, dim_in), dtype=jnp.float32)
    weight = jax.random.normal(kw, (2 * dim_out, dim_in), dtype=jnp.float32) * 0.02
    bias = jax.random.normal(kb, (2 * dim_out,), dtype=jnp.float32) * 0.01

    def ref_geglu(xv):
        proj = xv.reshape(-1, dim_in) @ weight.T + bias
        a, g = proj[:, :dim_out], proj[:, dim_out:]
        out = a * (0.5 * g * (1.0 + jax.lax.erf(g / jnp.sqrt(2.0))))
        return out.reshape(xv.shape[:-1] + (dim_out,))

    # f32 path (exact erf GELU)
    out = geglu(x, weight, bias)
    jax.block_until_ready(out)
    assert out.shape == (batch, seq, dim_out)
    assert jnp.allclose(out, ref_geglu(x), atol=1e-5, rtol=1e-5), "f32 mismatch"

    # ragged-M path (edge M block handled by the grid; no pad/slice round trip)
    x_r = x[:, :5, :]
    out_r = geglu(x_r, weight, bias)
    jax.block_until_ready(out_r)
    assert jnp.allclose(out_r, ref_geglu(x_r), atol=1e-5, rtol=1e-5), "ragged mismatch"

    # bf16 operands (bf16 MXU + f32 accumulation; bf16/EUP epilogue on v6e/v7x)
    out_bf16 = geglu(x.astype(jnp.bfloat16), weight, bias,
                     param_dtype=jnp.bfloat16)
    jax.block_until_ready(out_bf16)
    assert jnp.allclose(out_bf16.astype(jnp.float32), ref_geglu(x),
                        atol=2e-2, rtol=2e-2), "bf16 mismatch"

    print("KERNEL_OK")
</pallas_src>

<mosaic_0001>
module attributes {stable_mosaic.version = 11 : i64} {
  func.func @_geglu_kernel(%arg0: i32, %arg1: i32, %arg2: memref<16x32xf32, #tpu.memory_space<vmem>>, %arg3: memref<32x64xf32, #tpu.memory_space<vmem>>, %arg4: memref<1x64xf32, #tpu.memory_space<vmem>>, %arg5: memref<16x32xf32, #tpu.memory_space<vmem>>) attributes {dimension_semantics = [#tpu.dimension_semantics<parallel>, #tpu.dimension_semantics<parallel>], iteration_bounds = array<i64: 1, 1>, scalar_prefetch = 0 : i64, scratch_operands = 0 : i64, tpu.core_type = #tpu.core_type<tc>, window_params = [{transform_indices = @transform_0, window_bounds = array<i64: 16, 32>}, {transform_indices = @transform_1, window_bounds = array<i64: 32, 64>}, {transform_indices = @transform_2, window_bounds = array<i64: 1, 64>}, {transform_indices = @transform_3, window_bounds = array<i64: 16, 32>}]} {
    %c0 = arith.constant 0 : index
    %c0_0 = arith.constant 0 : index
    %0 = vector.load %arg2[%c0, %c0_0] : memref<16x32xf32, #tpu.memory_space<vmem>>, vector<16x32xf32>
    %c0_1 = arith.constant 0 : index
    %c0_2 = arith.constant 0 : index
    %1 = vector.load %arg3[%c0_1, %c0_2] : memref<32x64xf32, #tpu.memory_space<vmem>>, vector<32x64xf32>
    %cst = arith.constant dense<0.000000e+00> : vector<16x64xf32>
    %2 = tpu.matmul %0, %1, %cst {dimension_numbers = #tpu.dot_dimension_numbers<[1], [0], [0], [1], [0, 0, 1, 1], [], []>} : vector<16x32xf32>, vector<32x64xf32>, vector<16x64xf32> -> vector<16x64xf32>
    %c0_3 = arith.constant 0 : index
    %c0_4 = arith.constant 0 : index
    %3 = vector.load %arg4[%c0_3, %c0_4] : memref<1x64xf32, #tpu.memory_space<vmem>>, vector<1x64xf32>
    %4 = vector.broadcast %3 : vector<1x64xf32> to vector<16x64xf32>
    %5 = arith.addf %2, %4 : vector<16x64xf32>
    %6 = vector.extract_strided_slice %5 {offsets = [0, 0], sizes = [16, 32], strides = [1, 1]} : vector<16x64xf32> to vector<16x32xf32>
    %7 = vector.extract_strided_slice %5 {offsets = [0, 32], sizes = [16, 32], strides = [1, 1]} : vector<16x64xf32> to vector<16x32xf32>
    %cst_5 = arith.constant 5.000000e-01 : f32
    %8 = vector.broadcast %cst_5 : f32 to vector<16x32xf32>
    %9 = arith.mulf %8, %7 : vector<16x32xf32>
    %cst_6 = arith.constant 0.707106769 : f32
    %10 = vector.broadcast %cst_6 : f32 to vector<16x32xf32>
    %11 = arith.mulf %7, %10 : vector<16x32xf32>
    %12 = math.erf %11 : vector<16x32xf32>
    %cst_7 = arith.constant 1.000000e+00 : f32
    %13 = vector.broadcast %cst_7 : f32 to vector<16x32xf32>
    %14 = arith.addf %13, %12 : vector<16x32xf32>
    %15 = arith.mulf %9, %14 : vector<16x32xf32>
    %16 = arith.mulf %6, %15 : vector<16x32xf32>
    %c0_8 = arith.constant 0 : index
    %c0_9 = arith.constant 0 : index
    %17 = vector.load %arg5[%c0_8, %c0_9] : memref<16x32xf32, #tpu.memory_space<vmem>>, vector<16x32xf32>
    tpu.vector_store %arg5[%c0_8, %c0_9], %16 {strides = array<i32>} : memref<16x32xf32, #tpu.memory_space<vmem>>, vector<16x32xf32>,
    return
  }
  func.func @transform_0(%arg0: i32, %arg1: i32) -> (i32, i32) {
    %c0_i32 = arith.constant 0 : i32
    %c0_i32_0 = arith.constant 0 : i32
    return %arg1, %c0_i32 : i32, i32
  }
  func.func @transform_1(%arg0: i32, %arg1: i32) -> (i32, i32) {
    %c0_i32 = arith.constant 0 : i32
    %c0_i32_0 = arith.constant 0 : i32
    return %c0_i32, %arg0 : i32, i32
  }
  func.func @transform_2(%arg0: i32, %arg1: i32) -> (i32, i32) {
    %c0_i32 = arith.constant 0 : i32
    %c0_i32_0 = arith.constant 0 : i32
    return %c0_i32, %arg0 : i32, i32
  }
  func.func @transform_3(%arg0: i32, %arg1: i32) -> (i32, i32) {
    %c0_i32 = arith.constant 0 : i32
    return %arg1, %arg0 : i32, i32
  }
}

</mosaic_0001>

<bundles_post_ra>
// kernel: tpu_custom_call.1
= control target key start
LH: loop header
LB: loop body
LE: loop exit
PB: predicated region body
PF: predicated region fallthrough
CT: control target
= control target key end

     0   :  { %8 = vsyncpa [#allocation3], 0  ;;  %s366_s0 = inlined_call_operand.hbm [shape: f32[16,32], index: 0, kind: input, shape index: {}]   ;;  %s367_s1 = inlined_call_operand.hbm [shape: f32[32,64], index: 1, kind: input, shape index: {}]   ;;  %s368_s2 = inlined_call_operand.vmem [shape: f32[1,64], index: 2, kind: input, shape index: {}]   ;;  %s369_s3 = inlined_call_operand.hbm [shape: f32[16,32], index: 3, kind: output, shape index: {}]  }
   0x1   :  { %9 = vsyncpa [#allocation6], 0 }
   0x2   :  { %10 = vsyncpa [#allocation4], 0  ;;  %s288_s12 = smov [#allocation2]   ;;  %s216_s16 = scalar_lea.hbm %s366_s0, 256 }
   0x3   :  { %s16_s13 = sshll.u32 %s288_s12, 4  ;;  %p217_p0 = scmp.ne.s32.totalorder %s366_s0, %s216_s16  ;;  %s17_s13 = int_to_ptr.vmem [resolvable:$true] %s16_s13 }
   0x4   :  { %p220_p1 = scmp.lt.u32.totalorder %s216_s16, %s366_s0 }
   0x6   :  { %p222_p2 = pnand %p220_p1, %p217_p0 }
   0x8   :  { %225 = shalt.err (!%p222_p2)
}
   0x9   :  { %s226_s21 = scalar_lea.vmem %s17_s13, 256  ;;  %p231_p4 = scmp.lt.s32.totalorder %s17_s13, %s17_s13 }
   0xa   :  { %p227_p3 = scmp.ne.s32.totalorder %s17_s13, %s226_s21  ;;  %p232_p5 = scmp.lt.s32.totalorder %s226_s21, %s226_s21 }
   0xc   :  { %p233_p6 = por %p232_p5, %p231_p4 }
   0xe   :  { %p234_p7 = pnand %p233_p6, %p227_p3 }
  0x10   :  { %237 = shalt.err (!%p234_p7)
}
  0x11   :  { %s289_s22 = smov 128   ;;  %s290_s23 = smov 8  }
  0x12   :  { %22 = dma.hbm_to_vmem [thread:$0]  %s366_s0, 256, %s17_s13, [#allocation3], %s289_s22, %s289_s22, %s290_s23  }
  0x13   :  { %s291_s26 = smov [#allocation5]   ;;  %s238_s30 = scalar_lea.hbm %s367_s1, 512 }
  0x14   :  { %s28_s27 = sshll.u32 %s291_s26, 4  ;;  %p239_p8 = scmp.ne.s32.totalorder %s367_s1, %s238_s30  ;;  %s29_s27 = int_to_ptr.vmem [resolvable:$true] %s28_s27 }
  0x15   :  { %p242_p9 = scmp.lt.u32.totalorder %s238_s30, %s367_s1 }
  0x17   :  { %p244_p10 = pnand %p242_p9, %p239_p8 }
  0x19   :  { %247 = shalt.err (!%p244_p10)
}
  0x1a   :  { %s248_s8 = scalar_lea.vmem %s29_s27, 512  ;;  %p253_p12 = scmp.lt.s32.totalorder %s29_s27, %s29_s27 }
  0x1b   :  { %p249_p11 = scmp.ne.s32.totalorder %s29_s27, %s248_s8  ;;  %p254_p13 = scmp.lt.s32.totalorder %s248_s8, %s248_s8 }
  0x1d   :  { %p255_p0 = por %p254_p13, %p253_p12 }
  0x1f   :  { %p256_p1 = pnand %p255_p0, %p249_p11 }
  0x21   :  { %259 = shalt.err (!%p256_p1)
}
  0x22   :  { %34 = dma.hbm_to_vmem [thread:$0]  %s367_s1, 512, %s29_s27, [#allocation6], %s289_s22, %s289_s22, %s290_s23  }
  0x23   :  { %282 = dma.done.wait [#allocation3], 256  }
  0x24   :  { %283 = vsyncadd [#allocation3], 4294967040 }
  0x25   :  { %284 = dma.done.wait [#allocation6], 512  }
  0x26   :  { %285 = vsyncadd [#allocation6], 4294966784  ;;  %vm56_vm0 = vcmask 261120   ;;  %v45_v0 = vld [vmem:[#allocation5] sm:$0xff]  ;;  %v46_v1 = vld [vmem:[#allocation5 + $0x8] sm:$0xff]  ;;  %s292_s11 = smov 96  }
  0x27   :  { %v47_v2 = vld [vmem:[#allocation5 + $0x10] sm:$0xff]  ;;  %v198_v3 = vpack.c.bf16 %v46_v1, %v45_v0  ;;  %v48_v4 = vld [vmem:[#allocation5 + $0x18] sm:$0xff] }
  0x28   :  { %v43_v5 = vld [vmem:[#allocation2] sm:$0xff]  ;;  %v202_v6 = vpack.c.bf16 %v48_v4, %v47_v2  ;;  %v44_v7 = vld [vmem:[#allocation2 + $0x8] sm:$0xff] }
  0x29   :  { %195 = vmatprep.mubr.msk.f32.mxu0 %vm56_vm0, %v43_v5  ;;  %199 = vmatprep.subr.bf16.mxu0 %v198_v3  ;;  %v178_v8 = vld [vmem:[%s368_s2] ss:$0 sm:$0xff]  ;;  %s293_s2 = smov [#allocation7]  }
  0x2a   :  { %201 = vmatpush3.bf16.msra.mxu0 %v198_v3  ;;  %s165_s12 = sshll.u32 %s293_s2, 4  ;;  %s166_s12 = int_to_ptr.vmem [resolvable:$true] %s165_s12 }
  0x2b   :  { %203 = vmatprep.subr.bf16.mxu0 %v202_v6  ;;  %s260_s13 = scalar_lea.vmem %s166_s12, 256  ;;  %p265_p3 = scmp.lt.s32.totalorder %s166_s12, %s166_s12 }
  0x2c   :  { %p261_p2 = scmp.ne.s32.totalorder %s166_s12, %s260_s13  ;;  %p266_p4 = scmp.lt.s32.totalorder %s260_s13, %s260_s13 }
  0x2e   :  { %205 = vmatpush3.bf16.msra.mxu0 %v202_v6  ;;  %p267_p5 = por %p266_p4, %p265_p3 }
  0x30   :  { %p268_p6 = pnand %p267_p5, %p261_p2 }
  0x31   :  { %196 = vmatmul.mubr.msk.f32.vlgmr.msra.gmra.mrb[0].mxu0 %vm56_vm0, %v44_v7 }
 0x104   :  { %v197_v9 = vpop.f32.mrb[0].mxu0 }
 0x105   :  { %v135_v10 = vadd.f32 %v197_v9, %v178_v8  ;;  %v129_v11 = vpop.f32.mrb[1].mxu0 }
 0x106   :  { %v130_v12 = vadd.f32 %v178_v8, %v129_v11 }
 0x107   :  { %v141_v13 = vmul.f32 0.70710677, %v135_v10  ;;  %v139_v21 = vmul.f32 0.5, %v135_v10 }
 0x108   :  { %v140_v14 = vmul.f32 0.70710677, %v130_v12  ;;  %v138_v17 = vmul.f32 0.5, %v130_v12 }
 0x109   :  { %212 = verf.f32 %v141_v13 }
 0x10a   :  { %214 = verf.f32 %v140_v14 }
 0x113   :  { %v213_v15 = vpop.eup %212 }
 0x114   :  { %v215_v16 = vpop.eup %214  ;;  %v145_v20 = vadd.f32 1.0, %v213_v15 }
 0x115   :  { %v144_v18 = vadd.f32 1.0, %v215_v16 }
 0x116   :  { %v147_v22 = vmul.f32 %v145_v20, %v139_v21 }
 0x117   :  { %v146_v19 = vmul.f32 %v144_v18, %v138_v17 }
 0x119   :  { %150 = vrot.lane.b32.xlu0 %v146_v19, %s292_s11 }
 0x11d   :  { %152 = vrot.lane.b32.xlu0 %v147_v22, %s292_s11 }
 0x18b   :  { %v151_v23 = vpop.permute.xlu0 %150 }
 0x18c   :  { %v156_v24 = vmul.f32 %v151_v23, %v130_v12 }
 0x18e   :  { %158 = vst.msk [vmem:[#allocation7] sm:$0xff] %vm56_vm0, %v156_v24 }
 0x18f   :  { %v153_v25 = vpop.permute.xlu0 %152 }
 0x190   :  { %v157_v26 = vmul.f32 %v153_v25, %v135_v10 }
 0x192   :  { %159 = vst.msk [vmem:[#allocation7 + $0x8] sm:$0xff] %vm56_vm0, %v157_v26 }
 0x193   :  { %271 = shalt.err (!%p268_p6)
}
 0x194   :  { %s272_s16 = scalar_lea.hbm %s369_s3, 256 }
 0x195   :  { %p273_p7 = scmp.ne.s32.totalorder %s369_s3, %s272_s16  ;;  %p276_p8 = scmp.lt.u32.totalorder %s272_s16, %s369_s3 }
 0x197   :  { %p278_p9 = pnand %p276_p8, %p273_p7 }
 0x199   :  { %281 = shalt.err (!%p278_p9)
}
 0x19a   :  { %171 = dma.vmem_to_hbm [thread:$0]  %s166_s12, 256, %s369_s3, [#allocation4], %s289_s22, %s289_s22, %s290_s23  }
 0x19b   :  { %286 = dma.done.wait [#allocation4], 256  }
 0x19c   :  { %287 = vsyncadd [#allocation4], 4294967040 }
 0x19d   :  { %175 = vsyncpa [#allocation3], 1 }
 0x19e   :  { %176 = vsyncpa [#allocation6], 1 }
 0x19f   :  { %177 = vsyncpa [#allocation4], 1 }

</bundles_post_ra>
